<compile_context>
chip_gen: v7x
topology: tpu7x:2x2x1
jax: 0.10.0
libtpu: 0.0.40
codegen_flags: <defaults>
</compile_context>

<pallas_src>
import functools

import jax
import jax.numpy as jnp
from jax.experimental import pallas as pl
from jax.experimental.pallas import tpu as pltpu

_LANE = 128


def _mse_partial_kernel(*refs, has_mask, tile_rows, valid_rows):
    """Per-tile sum((x - y)^2 [* mask]) reduced over sublanes -> (1, 1, 128)."""
    if has_mask:
        x_ref, y_ref, m_ref, out_ref = refs
    else:
        x_ref, y_ref, out_ref = refs
        m_ref = None

    # In-register upcast to f32 (VPU has slack under the DMA; also covers v5e,
    # which has no bf16 VPU path) and keeps the accumulation in f32.
    x = x_ref[...].astype(jnp.float32)
    y = y_ref[...].astype(jnp.float32)
    d = x - y
    sq = d * d
    if m_ref is not None:
        sq = sq * m_ref[...].astype(jnp.float32)

    if valid_rows % tile_rows != 0:
        # Static config: the last grid block extends past the array; its
        # out-of-bounds rows hold unspecified data -> select 0 there.
        row = (pl.program_id(0) * tile_rows
               + jax.lax.broadcasted_iota(jnp.int32, (tile_rows, _LANE), 0))
        sq = jnp.where(row < valid_rows, sq, 0.0)

    # Per-tile reduction: VPU vreg adds + one small cross-sublane tree, all
    # hidden under the HBM DMA.  Writing a distinct lane-dense block per grid
    # step keeps the grid axis "parallel" and gives a tree-ish f32 accumulation
    # instead of a serial scalar chain.
    out_ref[...] = jnp.sum(sq, axis=0).reshape(1, 1, _LANE)


def mse_loss(x, y, mask=None, *, tile_rows=1024):
    """Pallas implementation of MSELoss.forward(x, y, mask)."""
    n = x.size

    # Round the tile to a multiple of 32 rows so the block satisfies the
    # second-minor tiling requirement for f32 (8), bf16 (16) and int8/bool (32).
    tile_rows = max(32, ((int(tile_rows) + 31) // 32) * 32)

    def to_slab(v):
        v = v.reshape(-1)
        rem = n % _LANE
        if rem:
            # Rare path: element count not lane-aligned.  Pad the tail with
            # zeros (zeros contribute nothing to the sum for x, y and mask).
            v = jnp.pad(v, (0, _LANE - rem))
        return v.reshape(-1, _LANE)  # free (no-copy) reshape when no pad ran

    if mask is not None:
        mask = jnp.broadcast_to(mask, x.shape)
        if mask.dtype == jnp.bool_:
            mask = mask.astype(jnp.int8)  # narrow mask stream; avoids i1 refs

    operands = [to_slab(x), to_slab(y)]
    has_mask = mask is not None
    if has_mask:
        operands.append(to_slab(mask))

    rows = operands[0].shape[0]
    tr = min(tile_rows, rows)                 # tr == rows (full dim) for small inputs
    num_blocks = (rows + tr - 1) // tr

    kernel = functools.partial(
        _mse_partial_kernel, has_mask=has_mask, tile_rows=tr, valid_rows=rows)

    in_spec = pl.BlockSpec((tr, _LANE), lambda i: (i, 0))
    partials = pl.pallas_call(
        kernel,
        out_shape=jax.ShapeDtypeStruct((num_blocks, 1, _LANE), jnp.float32),
        grid=(num_blocks,),
        in_specs=[in_spec] * len(operands),
        out_specs=pl.BlockSpec((1, 1, _LANE), lambda i: (i, 0, 0)),
        compiler_params=pltpu.CompilerParams(
            dimension_semantics=("parallel",)),
    )(*operands)

    # Glue: tiny cross-block + cross-lane reduce, then mean over ALL elements
    # (PyTorch masked semantics divide by N, not mask.sum()).
    return jnp.sum(partials) / jnp.float32(n)


if __name__ == "__main__":
    key = jax.random.PRNGKey(0)
    kx, ky, km = jax.random.split(key, 3)

    # Small NCHW-shaped example consistent with a conv-style pipeline.
    x = jax.random.normal(kx, (2, 4, 16, 16), dtype=jnp.float32)
    y = jax.random.normal(ky, (2, 4, 16, 16), dtype=jnp.float32)
    mask = (jax.random.uniform(km, (2, 4, 16, 16)) > 0.5).astype(jnp.int8)

    # Unmasked path (2-input kernel, no mask stream).
    loss = jax.block_until_ready(mse_loss(x, y))
    ref = jnp.mean((x - y) ** 2)
    assert jnp.allclose(loss, ref, rtol=1e-5, atol=1e-6), (loss, ref)

    # Masked path (mean over ALL elements, not mask.sum()).
    loss_m = jax.block_until_ready(mse_loss(x, y, mask))
    ref_m = jnp.mean(((x - y) ** 2) * mask.astype(jnp.float32))
    assert jnp.allclose(loss_m, ref_m, rtol=1e-5, atol=1e-6), (loss_m, ref_m)

    # Native bf16 inputs: kernel casts to f32 in-register.
    xb = x.astype(jnp.bfloat16)
    yb = y.astype(jnp.bfloat16)
    loss_b = jax.block_until_ready(mse_loss(xb, yb))
    ref_b = jnp.mean((xb.astype(jnp.float32) - yb.astype(jnp.float32)) ** 2)
    assert jnp.allclose(loss_b, ref_b, rtol=1e-4, atol=1e-5), (loss_b, ref_b)

    # Awkward size: exercises lane-tail padding, multi-block grid, and the
    # in-kernel row-validity mask for a partial last block.
    k2x, k2y = jax.random.split(kx)
    x2 = jax.random.normal(k2x, (5, 4, 33, 16), dtype=jnp.float32)
    y2 = jax.random.normal(k2y, (5, 4, 33, 16), dtype=jnp.float32)
    loss2 = jax.block_until_ready(mse_loss(x2, y2, tile_rows=32))
    ref2 = jnp.mean((x2 - y2) ** 2)
    assert jnp.allclose(loss2, ref2, rtol=1e-5, atol=1e-6), (loss2, ref2)

    print("KERNEL_OK")
</pallas_src>

<mosaic_0001>
module attributes {stable_mosaic.version = 11 : i64} {
  func.func @_mse_partial_kernel(%arg0: i32, %arg1: memref<16x128xf32, #tpu.memory_space<vmem>>, %arg2: memref<16x128xf32, #tpu.memory_space<vmem>>, %arg3: memref<1x1x128xf32, #tpu.memory_space<vmem>>) attributes {dimension_semantics = [#tpu.dimension_semantics<parallel>], iteration_bounds = array<i64: 1>, scalar_prefetch = 0 : i64, scratch_operands = 0 : i64, tpu.core_type = #tpu.core_type<tc>, window_params = [{transform_indices = @transform_0, window_bounds = array<i64: 16, 128>}, {transform_indices = @transform_1, window_bounds = array<i64: 16, 128>}, {transform_indices = @transform_2, window_bounds = array<i64: 1, 1, 128>}]} {
    %c0 = arith.constant 0 : index
    %c0_0 = arith.constant 0 : index
    %0 = vector.load %arg1[%c0, %c0_0] : memref<16x128xf32, #tpu.memory_space<vmem>>, vector<16x128xf32>
    %c0_1 = arith.constant 0 : index
    %c0_2 = arith.constant 0 : index
    %1 = vector.load %arg2[%c0_1, %c0_2] : memref<16x128xf32, #tpu.memory_space<vmem>>, vector<16x128xf32>
    %2 = arith.subf %0, %1 : vector<16x128xf32>
    %3 = arith.mulf %2, %2 : vector<16x128xf32>
    %cst = arith.constant dense<0.000000e+00> : vector<128xf32>
    %4 = vector.multi_reduction <add>, %3, %cst [0] : vector<16x128xf32> to vector<128xf32>
    %5 = vector.shape_cast %4 : vector<128xf32> to vector<1x1x128xf32>
    %c0_3 = arith.constant 0 : index
    %c0_4 = arith.constant 0 : index
    %c0_5 = arith.constant 0 : index
    %6 = vector.load %arg3[%c0_3, %c0_4, %c0_5] : memref<1x1x128xf32, #tpu.memory_space<vmem>>, vector<1x1x128xf32>
    tpu.vector_store %arg3[%c0_3, %c0_4, %c0_5], %5 {strides = array<i32>} : memref<1x1x128xf32, #tpu.memory_space<vmem>>, vector<1x1x128xf32>,
    return
  }
  func.func @transform_0(%arg0: i32) -> (i32, i32) {
    %c0_i32 = arith.constant 0 : i32
    %c0_i32_0 = arith.constant 0 : i32
    return %arg0, %c0_i32 : i32, i32
  }
  func.func @transform_1(%arg0: i32) -> (i32, i32) {
    %c0_i32 = arith.constant 0 : i32
    %c0_i32_0 = arith.constant 0 : i32
    return %arg0, %c0_i32 : i32, i32
  }
  func.func @transform_2(%arg0: i32) -> (i32, i32, i32) {
    %c0_i32 = arith.constant 0 : i32
    %c0_i32_0 = arith.constant 0 : i32
    %c0_i32_1 = arith.constant 0 : i32
    return %arg0, %c0_i32, %c0_i32_0 : i32, i32, i32
  }
}

</mosaic_0001>

<bundles_post_ra>
// kernel: tpu_custom_call.1
= control target key start
LH: loop header
LB: loop body
LE: loop exit
PB: predicated region body
PF: predicated region fallthrough
CT: control target
= control target key end

     0   :  { %7 = vsyncpa [#allocation3], 0  ;;  %s205_s0 = inlined_call_operand.hbm [shape: f32[16,128], index: 0, kind: input, shape index: {}]   ;;  %s206_s1 = inlined_call_operand.hbm [shape: f32[16,128], index: 1, kind: input, shape index: {}]   ;;  %s207_s2 = inlined_call_operand.hbm [shape: f32[1,1,128], index: 2, kind: output, shape index: {}]  }
   0x1   :  { %8 = vsyncpa [#allocation6], 0 }
   0x2   :  { %9 = vsyncpa [#allocation4], 0  ;;  %s149_s9 = smov [#allocation2]   ;;  %s77_s13 = scalar_lea.hbm %s205_s0, 256 }
   0x3   :  { %s15_s10 = sshll.u32 %s149_s9, 4  ;;  %p78_p0 = scmp.ne.s32.totalorder %s205_s0, %s77_s13  ;;  %s16_s10 = int_to_ptr.vmem [resolvable:$true] %s15_s10 }
   0x4   :  { %p81_p1 = scmp.lt.u32.totalorder %s77_s13, %s205_s0 }
   0x6   :  { %p83_p2 = pnand %p81_p1, %p78_p0 }
   0x8   :  { %86 = shalt.err (!%p83_p2)
}
   0x9   :  { %s87_s18 = scalar_lea.vmem %s16_s10, 256  ;;  %p92_p4 = scmp.lt.s32.totalorder %s16_s10, %s16_s10 }
   0xa   :  { %p88_p3 = scmp.ne.s32.totalorder %s16_s10, %s87_s18  ;;  %p93_p5 = scmp.lt.s32.totalorder %s87_s18, %s87_s18 }
   0xc   :  { %p94_p6 = por %p93_p5, %p92_p4 }
   0xe   :  { %p95_p7 = pnand %p94_p6, %p88_p3 }
  0x10   :  { %98 = shalt.err (!%p95_p7)
}
  0x11   :  { %s150_s19 = smov 128   ;;  %s151_s20 = smov 8  }
  0x12   :  { %21 = dma.hbm_to_vmem [thread:$0]  %s205_s0, 256, %s16_s10, [#allocation3], %s150_s19, %s150_s19, %s151_s20  }
  0x13   :  { %s152_s23 = smov [#allocation5]   ;;  %s99_s27 = scalar_lea.hbm %s206_s1, 256 }
  0x14   :  { %s27_s24 = sshll.u32 %s152_s23, 4  ;;  %p100_p8 = scmp.ne.s32.totalorder %s206_s1, %s99_s27  ;;  %s28_s24 = int_to_ptr.vmem [resolvable:$true] %s27_s24 }
  0x15   :  { %p103_p9 = scmp.lt.u32.totalorder %s99_s27, %s206_s1 }
  0x17   :  { %p105_p10 = pnand %p103_p9, %p100_p8 }
  0x19   :  { %108 = shalt.err (!%p105_p10)
}
  0x1a   :  { %s109_s4 = scalar_lea.vmem %s28_s24, 256  ;;  %p114_p12 = scmp.lt.s32.totalorder %s28_s24, %s28_s24 }
  0x1b   :  { %p110_p11 = scmp.ne.s32.totalorder %s28_s24, %s109_s4  ;;  %p115_p13 = scmp.lt.s32.totalorder %s109_s4, %s109_s4 }
  0x1d   :  { %p116_p0 = por %p115_p13, %p114_p12 }
  0x1f   :  { %p117_p1 = pnand %p116_p0, %p110_p11 }
  0x21   :  { %120 = shalt.err (!%p117_p1)
}
  0x22   :  { %33 = dma.hbm_to_vmem [thread:$0]  %s206_s1, 256, %s28_s24, [#allocation6], %s150_s19, %s150_s19, %s151_s20  }
  0x23   :  { %143 = dma.done.wait [#allocation3], 256  }
  0x24   :  { %144 = vsyncadd [#allocation3], 4294967040 }
  0x25   :  { %145 = dma.done.wait [#allocation6], 256  }
  0x26   :  { %146 = vsyncadd [#allocation6], 4294967040  ;;  %v40_v0 = vld [vmem:[#allocation2] sm:$0xff]  ;;  %v41_v1 = vld [vmem:[#allocation2 + $0x8] sm:$0xff]  ;;  %s153_s6 = smov [#allocation7]  }
  0x27   :  { %v42_v2 = vld [vmem:[#allocation5] sm:$0xff]  ;;  %v43_v3 = vld [vmem:[#allocation5 + $0x8] sm:$0xff]  ;;  %s62_s7 = sshll.u32 %s153_s6, 4  ;;  %s63_s7 = int_to_ptr.vmem [resolvable:$true] %s62_s7 }
  0x28   :  { %v44_v4 = vsub.f32 %v40_v0, %v42_v2  ;;  %v45_v5 = vsub.f32 %v41_v1, %v43_v3  ;;  %s121_s1 = scalar_lea.vmem %s63_s7, 16  ;;  %s125_s8 = scalar_lea.vmem %s63_s7, 32 }
  0x29   :  { %p122_p2 = scmp.ne.s32.totalorder %s63_s7, %s121_s1  ;;  %p126_p3 = scmp.lt.s32.totalorder %s63_s7, %s63_s7 }
  0x2a   :  { %v46_v6 = vmul.f32 %v44_v4, %v44_v4  ;;  %v47_v7 = vmul.f32 %v45_v5, %v45_v5  ;;  %p127_p4 = scmp.lt.s32.totalorder %s125_s8, %s121_s1 }
  0x2c   :  { %v48_v8 = vadd.f32 %v47_v7, %v46_v6  ;;  %p128_p5 = por %p127_p4, %p126_p3 }
  0x2e   :  { %v49_v9 = vrot.slane %v48_v8, 4  ;;  %p129_p6 = pnand %p128_p5, %p122_p2 }
  0x30   :  { %v50_v10 = vadd.f32 %v49_v9, %v48_v8 }
  0x32   :  { %v51_v11 = vrot.slane %v50_v10, 2 }
  0x34   :  { %v52_v12 = vadd.f32 %v51_v11, %v50_v10 }
  0x36   :  { %v53_v13 = vrot.slane %v52_v12, 1 }
  0x38   :  { %v54_v14 = vadd.f32 %v53_v13, %v52_v12 }
  0x3a   :  { %55 = vst [vmem:[#allocation7] sm:$0x1] %v54_v14 }
  0x3b   :  { %132 = shalt.err (!%p129_p6)
}
  0x3c   :  { %s133_s11 = scalar_lea.hbm %s207_s2, 16 }
  0x3d   :  { %p134_p7 = scmp.ne.s32.totalorder %s207_s2, %s133_s11  ;;  %p137_p8 = scmp.lt.u32.totalorder %s133_s11, %s207_s2 }
  0x3f   :  { %p139_p9 = pnand %p137_p8, %p134_p7 }
  0x41   :  { %142 = shalt.err (!%p139_p9)
}
  0x42   :  { %65 = dma.vmem_to_hbm [thread:$0]  %s63_s7, 16, %s207_s2, [#allocation4]  }
  0x43   :  { %147 = dma.done.wait [#allocation4], 16  }
  0x44   :  { %148 = vsyncadd [#allocation4], 4294967280 }
  0x45   :  { %69 = vsyncpa [#allocation3], 1 }
  0x46   :  { %70 = vsyncpa [#allocation6], 1 }
  0x47   :  { %71 = vsyncpa [#allocation4], 1 }

</bundles_post_ra>
